<compile_context>
chip_gen: v7x
topology: tpu7x:2x2x1
jax: 0.10.0
libtpu: 0.0.40
codegen_flags: <defaults>
</compile_context>

<pallas_src>
import jax
import jax.numpy as jnp
from jax.experimental import pallas as pl
from jax.experimental.pallas import tpu as pltpu


def _se_kernel(x_ref, valid_ref, w1t_ref, w2t_ref, o_ref):
    x = x_ref[...]            # (TB, C, L) float32
    valid = valid_ref[...]    # (TB, 1, L) float32, 1.0 = valid, 0.0 = padded

    # --- masked global average pooling over L ---
    masked_x = x * valid                                        # (TB, C, L)
    sum_x = jnp.sum(masked_x, axis=-1)                          # (TB, C)
    cnt = jnp.maximum(jnp.sum(valid, axis=-1), 1.0)             # (TB, 1), clamp(min=1)
    pooled = sum_x / cnt                                        # (TB, C)

    # --- squeeze-excite MLP: fc1 (no bias) -> ReLU -> fc2 (no bias) -> sigmoid ---
    h = jnp.dot(pooled, w1t_ref[...],
                preferred_element_type=jnp.float32)             # (TB, Cmid)
    h = jnp.maximum(h, 0.0)
    g = jnp.dot(h, w2t_ref[...],
                preferred_element_type=jnp.float32)             # (TB, C)
    g = jax.nn.sigmoid(g)

    # --- gate: zero at padded positions (masked_fill), broadcast over L, scale x ---
    o_ref[...] = (x * g[:, :, None] * valid).astype(o_ref.dtype)


def _pick_block_b(B, max_tb=8):
    """Largest batch tile <= max_tb dividing B while keeping grid >= 2 (if B >= 2)."""
    best = 1
    for tb in range(1, min(B, max_tb) + 1):
        if B % tb == 0 and (B // tb >= 2 or B == 1):
            best = tb
    return best


def masked_se_block_1d(x, mask, w_fc1, w_fc2, *, block_b=None):
    """
    x:     (B, C, L) float
    mask:  (B, 1, L) bool, True = padded
    w_fc1: (C//r, C)  fc1.weight (no bias)
    w_fc2: (C, C//r)  fc2.weight (no bias)
    """
    B, C, L = x.shape
    C_mid = w_fc1.shape[0]
    assert w_fc1.shape == (C_mid, C) and w_fc2.shape == (C, C_mid)
    assert mask.shape == (B, 1, L)

    # Host-side prep (cheap, one-off): float valid mask + pre-transposed weights
    # so the kernel does plain row-major matmuls.
    valid = jnp.logical_not(mask).astype(x.dtype)     # (B, 1, L)
    w1_t = jnp.asarray(w_fc1, x.dtype).T              # (C, C_mid)
    w2_t = jnp.asarray(w_fc2, x.dtype).T              # (C_mid, C)

    if block_b is None:
        block_b = _pick_block_b(B)
    assert B % block_b == 0
    grid = (B // block_b,)

    return pl.pallas_call(
        _se_kernel,
        out_shape=jax.ShapeDtypeStruct((B, C, L), x.dtype),
        grid_spec=pltpu.PrefetchScalarGridSpec(
            num_scalar_prefetch=0,
            grid=grid,
            in_specs=[
                pl.BlockSpec((block_b, C, L), lambda b: (b, 0, 0)),
                pl.BlockSpec((block_b, 1, L), lambda b: (b, 0, 0)),
                pl.BlockSpec((C, C_mid), lambda b: (0, 0)),
                pl.BlockSpec((C_mid, C), lambda b: (0, 0)),
            ],
            out_specs=pl.BlockSpec((block_b, C, L), lambda b: (b, 0, 0)),
        ),
        compiler_params=pltpu.CompilerParams(
            dimension_semantics=("parallel",)),
    )(x, valid, w1_t, w2_t)


def reference(x, mask, w_fc1, w_fc2):
    """Pure-JAX reference matching the PyTorch MaskedSEBlock1D (pooling='avg')."""
    valid = jnp.logical_not(mask).astype(x.dtype)               # (B, 1, L)
    valid_e = jnp.broadcast_to(valid, x.shape)                  # (B, C, L)
    sum_x = (x * valid_e).sum(axis=-1)                          # (B, C)
    cnt = jnp.clip(valid_e.sum(axis=-1), 1.0, None)             # (B, C), clamp(min=1)
    y = sum_x / cnt
    y = jnp.maximum(y @ w_fc1.T, 0.0)                           # fc1 + ReLU
    y = jax.nn.sigmoid(y @ w_fc2.T)                             # fc2 + sigmoid, (B, C)
    y = y[:, :, None] * valid                                   # masked_fill(mask, 0)
    return x * y


if __name__ == "__main__":
    B, C, L = 4, 32, 128
    REDUCTION = 16
    C_MID = C // REDUCTION                                       # = 2

    key = jax.random.PRNGKey(0)
    k_x, k_w1, k_w2 = jax.random.split(key, 3)

    x = jax.random.normal(k_x, (B, C, L), jnp.float32)
    # fc weights (no bias), PyTorch nn.Linear layout: (out_features, in_features)
    w_fc1 = jax.random.normal(k_w1, (C_MID, C), jnp.float32) * 0.2
    w_fc2 = jax.random.normal(k_w2, (C, C_MID), jnp.float32) * 0.2

    # Bool mask, True = padded. Varying valid lengths, including a fully-padded
    # row to exercise the count clamp(min=1).
    lengths = jnp.array([L, 96, 50, 0], dtype=jnp.int32)
    mask = (jnp.arange(L)[None, None, :] >= lengths[:, None, None])  # (B, 1, L)

    out = masked_se_block_1d(x, mask, w_fc1, w_fc2)
    out = jax.block_until_ready(out)

    ref = jax.block_until_ready(reference(x, mask, w_fc1, w_fc2))
    if not jnp.allclose(out, ref, rtol=1e-5, atol=1e-5):
        raise AssertionError("Pallas kernel output does not match JAX reference")

    print("KERNEL_OK")
</pallas_src>

<mosaic_0001>
module attributes {stable_mosaic.version = 11 : i64} {
  func.func @_se_kernel(%arg0: i32, %arg1: memref<2x32x128xf32, #tpu.memory_space<vmem>>, %arg2: memref<2x1x128xf32, #tpu.memory_space<vmem>>, %arg3: memref<32x2xf32, #tpu.memory_space<vmem>>, %arg4: memref<2x32xf32, #tpu.memory_space<vmem>>, %arg5: memref<2x32x128xf32, #tpu.memory_space<vmem>>) attributes {dimension_semantics = [#tpu.dimension_semantics<parallel>], iteration_bounds = array<i64: 2>, scalar_prefetch = 0 : i64, scratch_operands = 0 : i64, tpu.core_type = #tpu.core_type<tc>, window_params = [{transform_indices = @transform_0, window_bounds = array<i64: 2, 32, 128>}, {transform_indices = @transform_1, window_bounds = array<i64: 2, 1, 128>}, {pipeline_mode = #tpu.pipeline_mode<synchronous>, transform_indices = @transform_2, window_bounds = array<i64: 32, 2>}, {pipeline_mode = #tpu.pipeline_mode<synchronous>, transform_indices = @transform_3, window_bounds = array<i64: 2, 32>}, {transform_indices = @transform_4, window_bounds = array<i64: 2, 32, 128>}]} {
    %c0 = arith.constant 0 : index
    %c0_0 = arith.constant 0 : index
    %c0_1 = arith.constant 0 : index
    %0 = vector.load %arg1[%c0, %c0_0, %c0_1] : memref<2x32x128xf32, #tpu.memory_space<vmem>>, vector<2x32x128xf32>
    %c0_2 = arith.constant 0 : index
    %c0_3 = arith.constant 0 : index
    %c0_4 = arith.constant 0 : index
    %1 = vector.load %arg2[%c0_2, %c0_3, %c0_4] : memref<2x1x128xf32, #tpu.memory_space<vmem>>, vector<2x1x128xf32>
    %2 = vector.broadcast %1 : vector<2x1x128xf32> to vector<2x32x128xf32>
    %3 = arith.mulf %0, %2 : vector<2x32x128xf32>
    %cst = arith.constant dense<0.000000e+00> : vector<2x32xf32>
    %4 = vector.multi_reduction <add>, %3, %cst [2] : vector<2x32x128xf32> to vector<2x32xf32>
    %cst_5 = arith.constant dense<0.000000e+00> : vector<2x1xf32>
    %5 = vector.multi_reduction <add>, %1, %cst_5 [2] : vector<2x1x128xf32> to vector<2x1xf32>
    %cst_6 = arith.constant 1.000000e+00 : f32
    %6 = vector.broadcast %cst_6 : f32 to vector<2x1xf32>
    %7 = arith.maximumf %5, %6 : vector<2x1xf32>
    %8 = vector.broadcast %7 : vector<2x1xf32> to vector<2x32xf32>
    %9 = arith.divf %4, %8 : vector<2x32xf32>
    %c0_7 = arith.constant 0 : index
    %c0_8 = arith.constant 0 : index
    %10 = vector.load %arg3[%c0_7, %c0_8] : memref<32x2xf32, #tpu.memory_space<vmem>>, vector<32x2xf32>
    %cst_9 = arith.constant dense<0.000000e+00> : vector<2x2xf32>
    %11 = tpu.matmul %9, %10, %cst_9 {dimension_numbers = #tpu.dot_dimension_numbers<[1], [0], [0], [1], [0, 0, 1, 1], [], []>} : vector<2x32xf32>, vector<32x2xf32>, vector<2x2xf32> -> vector<2x2xf32>
    %cst_10 = arith.constant 0.000000e+00 : f32
    %12 = vector.broadcast %cst_10 : f32 to vector<2x2xf32>
    %13 = arith.maximumf %11, %12 : vector<2x2xf32>
    %c0_11 = arith.constant 0 : index
    %c0_12 = arith.constant 0 : index
    %14 = vector.load %arg4[%c0_11, %c0_12] : memref<2x32xf32, #tpu.memory_space<vmem>>, vector<2x32xf32>
    %cst_13 = arith.constant dense<0.000000e+00> : vector<2x32xf32>
    %15 = tpu.matmul %13, %14, %cst_13 {dimension_numbers = #tpu.dot_dimension_numbers<[1], [0], [0], [1], [0, 0, 1, 1], [], []>} : vector<2x2xf32>, vector<2x32xf32>, vector<2x32xf32> -> vector<2x32xf32>
    %16 = arith.negf %15 : vector<2x32xf32>
    %17 = math.exp %16 : vector<2x32xf32>
    %cst_14 = arith.constant 1.000000e+00 : f32
    %18 = vector.broadcast %cst_14 : f32 to vector<2x32xf32>
    %19 = arith.addf %18, %17 : vector<2x32xf32>
    %20 = arith.divf %18, %19 : vector<2x32xf32>
    %21 = vector.shape_cast %20 : vector<2x32xf32> to vector<2x32x1xf32>
    %22 = vector.broadcast %21 : vector<2x32x1xf32> to vector<2x32x128xf32>
    %23 = arith.mulf %0, %22 : vector<2x32x128xf32>
    %24 = vector.broadcast %1 : vector<2x1x128xf32> to vector<2x32x128xf32>
    %25 = arith.mulf %23, %24 : vector<2x32x128xf32>
    %c0_15 = arith.constant 0 : index
    %c0_16 = arith.constant 0 : index
    %c0_17 = arith.constant 0 : index
    %26 = vector.load %arg5[%c0_15, %c0_16, %c0_17] : memref<2x32x128xf32, #tpu.memory_space<vmem>>, vector<2x32x128xf32>
    tpu.vector_store %arg5[%c0_15, %c0_16, %c0_17], %25 {strides = array<i32>} : memref<2x32x128xf32, #tpu.memory_space<vmem>>, vector<2x32x128xf32>,
    return
  }
  func.func @transform_0(%arg0: i32) -> (i32, i32, i32) {
    %c0_i32 = arith.constant 0 : i32
    %c0_i32_0 = arith.constant 0 : i32
    %c0_i32_1 = arith.constant 0 : i32
    return %arg0, %c0_i32, %c0_i32_0 : i32, i32, i32
  }
  func.func @transform_1(%arg0: i32) -> (i32, i32, i32) {
    %c0_i32 = arith.constant 0 : i32
    %c0_i32_0 = arith.constant 0 : i32
    %c0_i32_1 = arith.constant 0 : i32
    return %arg0, %c0_i32, %c0_i32_0 : i32, i32, i32
  }
  func.func @transform_2(%arg0: i32) -> (i32, i32) {
    %c0_i32 = arith.constant 0 : i32
    %c0_i32_0 = arith.constant 0 : i32
    %c0_i32_1 = arith.constant 0 : i32
    return %c0_i32, %c0_i32_0 : i32, i32
  }
  func.func @transform_3(%arg0: i32) -> (i32, i32) {
    %c0_i32 = arith.constant 0 : i32
    %c0_i32_0 = arith.constant 0 : i32
    %c0_i32_1 = arith.constant 0 : i32
    return %c0_i32, %c0_i32_0 : i32, i32
  }
  func.func @transform_4(%arg0: i32) -> (i32, i32, i32) {
    %c0_i32 = arith.constant 0 : i32
    %c0_i32_0 = arith.constant 0 : i32
    %c0_i32_1 = arith.constant 0 : i32
    return %arg0, %c0_i32, %c0_i32_0 : i32, i32, i32
  }
}

</mosaic_0001>

<bundles_post_ra>
// kernel: tpu_custom_call.1
= control target key start
LH: loop header
LB: loop body
LE: loop exit
PB: predicated region body
PF: predicated region fallthrough
CT: control target
= control target key end

     0   :  { %9 = vsyncpa [#allocation3], 0  ;;  %s1202_s0 = inlined_call_operand.hbm [shape: f32[4,32,128], index: 0, kind: input, shape index: {}]   ;;  %s1203_s1 = inlined_call_operand.vmem [shape: f32[4,1,128], index: 1, kind: input, shape index: {}]   ;;  %s1204_s2 = inlined_call_operand.vmem [shape: f32[32,2], index: 2, kind: input, shape index: {}]   ;;  %s1205_s3 = inlined_call_operand.vmem [shape: f32[2,32], index: 3, kind: input, shape index: {}]   ;;  %s1206_s4 = inlined_call_operand.hbm [shape: f32[4,32,128], index: 4, kind: output, shape index: {}]  }
   0x1   :  { %11 = vsyncpa [#allocation3 + $0x1], 0 }
   0x2   :  { %12 = vsyncpa [#allocation4], 0 }
   0x3   :  { %14 = vsyncpa [#allocation4 + $0x1], 0  ;;  %s936_s15 = smov 0   ;;  %s938_s16 = smov 0  }
   0x4   :  { %s940_s17 = smov 0   ;;  %s942_s18 = smov 0  }
   0x5 LB: > { %s957_s19 = sadd.s32 4294967295, %s900_s18   ;;  %s689_s20 = sadd.s32 4294967294, %s900_s18   ;;  %s900_s18 = sphi %s942_s18, %s1219_s18   ;;  %s896_s17 = sphi %s940_s17, %s1218_s17   ;;  %s892_s16 = sphi %s938_s16, %s1217_s16   ;;  %s888_s15 = sphi %s936_s15, %s1216_s15  }
   0x6   : > { %s961_s21 = sadd.s32 1, %s900_s18   ;;  %s27_s22 = sadd.s32 1, %s896_s17 }
   0x7   : > { %s24_s23 = ssub.s32 %s900_s18, %s961_s21  ;;  %p34_p0 = scmp.ne.s32.totalorder %s896_s17, %s892_s16 }
   0x8   : > { %p25_p1 = scmp.eq.s32.totalorder %s24_s23, 0  ;;  %p35_p2 = scmp.eq.s32.totalorder %s900_s18, 0 }
   0x9   : > { %p40_p3 = scmp.ne.s32.totalorder %s892_s16, %s888_s15  ;;  %p41_p4 = scmp.eq.s32.totalorder %s957_s19, 0 }
   0xa   : > { %s973_s24 = scalar_select %p25_p1, %s896_s17, %s27_s22  }
   0xb   : > { %p975_p5 = por %p35_p2, %p34_p0  ;;  %p979_p6 = por %p41_p4, %p40_p3 }
   0xc   : > { %p132_p7 = scmp.eq.s32.totalorder %s957_s19, 1  ;;  %p138_p8 = scmp.eq.s32.totalorder %s689_s20, 1 }
   0xd   : > { %p755_p10 = scmp.lt.s32.totalorder %s900_s18, 2  ;;  %s164_s29 = sand.u32 1, %s896_s17  }
   0xe   : > { %p986_p11 = por %p132_p7, %p34_p0  ;;  %p990_p12 = por %p138_p8, %p40_p3 }
   0xf   : > { %s711_s30 = sshll.u32 %s900_s18, 10  ;;  %s692_s5 = sshll.u32 %s164_s29, 6 }
  0x10   : > { %s1210_s27 = scalar_select %p986_p11, 1, 0 }
  0x11   : > { %s1211_s28 = scalar_select %p990_p12, 1, 0 }
  0x12   : > { %s999_s8 = scalar_lea.hbm %s1202_s0, %s711_s30  ;;  %s168_s9 = scalar_lea.vmem [#allocation2], %s692_s5 }
  0x13   : > { %s176_s10 = sshll.u32 %s168_s9, 4  ;;  %p1003_p13 = pnand %p755_p10, %p975_p5  ;;  %s1007_s10 = int_to_ptr.vmem [resolvable:$true] %s176_s10 }
  0x14   : > { %s1009_s12 = scalar_lea.sflag [#allocation3], %s164_s29  ;;  %s804_s13 = scalar_lea.hbm %s999_s8, 1024 }
  0x15   : > { %p805_p0 = scmp.ne.s32.totalorder %s999_s8, %s804_s13  ;;  %p806_p1 = pneg %p1003_p13 }
  0x16   : > { %s809_s22 = scalar_lea.hbm %s1202_s0, 2048  ;;  %p810_p4 = scmp.lt.u32.totalorder %s999_s8, %s1202_s0 }
  0x17   : > { %p807_p2 = pnand %p806_p1, %p805_p0  ;;  %p811_p5 = scmp.lt.u32.totalorder %s809_s22, %s804_s13 }
  0x18   : > { %p813_p8 = scmp.lt.u32.totalorder %s804_s13, %s999_s8 }
  0x19   : > { %p808_p3 = pneg %p807_p2  ;;  %p812_p7 = por %p811_p5, %p810_p4 }
  0x1b   : > { %p814_p10 = por %p813_p8, %p812_p7 }
  0x1d   : > { %p815_p9 = pnand %p814_p10, %p808_p3 }
  0x1f   : > { %818 = shalt.err (!%p815_p9)
}
  0x20   : > { %s819_s29 = scalar_lea.vmem %s1007_s10, 1024  ;;  %s902_s30 = smov [#allocation2]  }
  0x21   : > { %p820_p0 = scmp.ne.s32.totalorder %s1007_s10, %s819_s29  ;;  %s824_s5 = sshll.u32 %s902_s30, 4  ;;  %s825_s5 = int_to_ptr.vmem [resolvable:$false] %s824_s5 }
  0x22   : > { %s826_s6 = scalar_lea.vmem %s825_s5, 2048  ;;  %p827_p11 = scmp.lt.s32.totalorder %s1007_s10, %s825_s5 }
  0x23   : > { %p822_p2 = pnand %p820_p0, %p806_p1  ;;  %p828_p4 = scmp.lt.s32.totalorder %s826_s6, %s819_s29 }
  0x25   : > { %p823_p12 = pneg %p822_p2  ;;  %p829_p5 = por %p828_p4, %p827_p11 }
  0x27   : > { %p830_p7 = pnand %p829_p5, %p823_p12 }
  0x29   : > { %833 = shalt.err (!%p830_p7)
}
  0x2a   : > { %s903_s7 = smov 128   ;;  %s904_s9 = smov 8  }
  0x2b   : > { %750 = dma.hbm_to_vmem [thread:$0]  (!%p1003_p13), %s999_s8, 1024, %s1007_s10, %s1009_s12, %s903_s7, %s903_s7, %s904_s9  }
  0x2c   : > { %p696_p9 = scmp.ge.s32.totalorder %s900_s18, 1  ;;  %p192_p1 = scmp.lt.s32.totalorder %s900_s18, 3 }
  0x2e   : > { %p193_p3 = pnand %p696_p9, %p192_p1 }
  0x2f   : > { %s1040_s13 = sand.u32 (!%p193_p3), 1, %s892_s16  }
  0x30   : > { %196 = sbr.rel (%p193_p3) target bundleno = 836 (0x344), region = 36  ;;  %s697_s14 = sshll.u32 (!%p193_p3), %s1040_s13, 6 }
  0x31   : > { %s199_s20 = scalar_lea.sflag (!%p193_p3), [#allocation3], %s1040_s13  ;;  %s1046_s22 = scalar_lea.vmem (!%p193_p3), [#allocation2], %s697_s14 }
  0x37   : > { %879 = dma.done.wait (%p979_p6), %s199_s20, 1024  }
  0x38   : > { %881 = vsyncadd (%p979_p6), %s199_s20, 4294966272  ;;  %s699_s8 = sshll.u32 %s957_s19, 1  ;;  %v250_v0 = vlaneseq  ;;  %vm284_vm0 = vcmask 1040384   ;;  %v1062_v4 = vld [vmem:[%s1046_s22] sm:$0xff]  ;;  %v1071_v9 = vld [vmem:[%s1046_s22 + $0x8] sm:$0xff]  ;;  %v905_v28 = vmov 0.0|0.0  }
  0x39   : > { %p233_p11 = scmp.lt.s32.totalorder %s699_s8, 3  ;;  %v1076_v12 = vld [vmem:[%s1046_s22 + $0x20] sm:$0xff]  ;;  %v1083_v15 = vld [vmem:[%s1046_s22 + $0x28] sm:$0xff]  ;;  %v1086_v16 = vld [vmem:[%s1046_s22 + $0x10] sm:$0xff]  ;;  %737 = vmatprep.subr.bf16.mxu0 %v905_v28  ;;  %vm906_vm1 = vmmov 0   ;;  %v907_v32 = vmov 0.0  }
  0x3a   : > { %v1053_v1 = vshrl.u32 %v250_v0, 7  ;;  %v1093_v19 = vld [vmem:[%s1046_s22 + $0x30] sm:$0xff]  ;;  %v1096_v20 = vld [vmem:[%s1046_s22 + $0x18] sm:$0xff]  ;;  %v311_v25 = vld [vmem:[%s1204_s2] sm:$0xff]  ;;  %729 = vmatprep.mubr.msk.f32.mxu0 %vm906_vm1, %v907_v32  ;;  %732 = vmatprep.subr.mxu1 %v907_v32  ;;  %v324_v39 = vand.u32 127, %v250_v0  ;;  %vm334_vm2 = vcmask 130112  }
  0x3b   : > { %s1221_s8 = smov (!%p233_p11, %s699_s8), 3  ;;  %v1103_v23 = vld [vmem:[%s1046_s22 + $0x38] sm:$0xff]  ;;  %v312_v26 = vld [vmem:[%s1204_s2 + $0x8] sm:$0xff]  ;;  %v313_v29 = vld [vmem:[%s1204_s2 + $0x10] sm:$0xff]  ;;  %734 = vmatprep.mubr.msk.f32.mxu1 %vm906_vm1, %v907_v32  ;;  %vm341_vm3 = vcmask 195712   ;;  %vm348_vm4 = vcmask 261312  }
  0x3c   : > { %v1056_v2 = vsub.s32 0, %v1053_v1  ;;  %s235_s12 = scalar_lea.vmem %s1203_s1, %s1221_s8  ;;  %v738_v27 = vpack.c.bf16 %v312_v26, %v311_v25  ;;  %v314_v30 = vld [vmem:[%s1204_s2 + $0x18] sm:$0xff]  ;;  %v329_v43 = vadd.s32 4294967288, %v324_v39  ;;  %v336_v45 = vadd.s32 4294967280, %v324_v39  ;;  %s230_s22 = scalar_lea.vmem [#allocation5], %s697_s14 }
  0x3d   : > { %v246_v3 = vld [vmem:[%s235_s12] sm:$0x1]  ;;  %v247_v5 = vld [vmem:[%s235_s12 + $0x1] sm:$0x1]  ;;  %v741_v31 = vpack.c.bf16 %v314_v30, %v313_v29  ;;  %v327_v47 = vsub.s32 %v324_v39, %v1053_v1  ;;  %v343_v49 = vadd.s32 4294967272, %v324_v39  ;;  %vm369_vm5 = vcmask 1041409  }
  0x3e   : > { %v285_v6 = vsel %vm284_vm0, %v246_v3, 0.0  ;;  %v1065_v7 = vrot.slane %v246_v3, %v1056_v2  ;;  %v1068_v8 = vrot.slane %v247_v5, %v1056_v2  ;;  %v288_v11 = vsel %vm284_vm0, %v247_v5, 0.0  ;;  %739 = vmatpush3.bf16.msra.mxu0 %v738_v27  ;;  %s607_s14 = sshll.u32 %s230_s22, 4  ;;  %s713_s8 = sshll.u32 %s957_s19, 10  ;;  %s1151_s14 = int_to_ptr.vmem [resolvable:$true] %s607_s14 }
  0x3f   : > { %286 = vadd.xlane.f32.xlu0 %v285_v6  ;;  %740 = vmatprep.subr.bf16.mxu0 %v905_v28  ;;  %v332_v48 = vsub.s32 %v329_v43, %v1053_v1  ;;  %v339_v51 = vsub.s32 %v336_v45, %v1053_v1  ;;  %v346_v59 = vsub.s32 %v343_v49, %v1053_v1  ;;  %vm371_vm6 = vcmask 261120   ;;  %v445_v28 = vld [vmem:[%s1205_s3] sm:$0x3]  ;;  %s1157_s12 = scalar_lea.hbm %s1206_s4, %s713_s8  ;;  %s593_s26 = scalar_lea.sflag [#allocation4], %s1040_s13 }
  0x40   : > { %v260_v10 = vmul.f32 %v1065_v7, %v1062_v4  ;;  %v261_v13 = vmul.f32 %v1065_v7, %v1071_v9  ;;  %v264_v14 = vmul.f32 %v1068_v8, %v1076_v12  ;;  %v265_v17 = vmul.f32 %v1068_v8, %v1083_v15  ;;  %s834_s23 = scalar_lea.vmem %s1151_s14, 1024  ;;  %p1213_p12 = scmp.ne.s32.totalorder %s1210_s27, 0 }
  0x41   : > { %v262_v18 = vmul.f32 %v1065_v7, %v1086_v16  ;;  %v266_v21 = vmul.f32 %v1068_v8, %v1093_v19  ;;  %v263_v22 = vmul.f32 %v1065_v7, %v1096_v20  ;;  %v267_v24 = vmul.f32 %v1068_v8, %v1103_v23  ;;  %p835_p6 = scmp.ne.s32.totalorder %s1151_s14, %s834_s23  ;;  %s908_s19 = smov [#allocation5]  }
  0x42   : > { %268 = vadd.xlane.f32.xlu1 %v260_v10  ;;  %742 = vmatpush3.bf16.msra.mxu0 %v741_v31  ;;  %vm450_vm7 = vcmask 1041408   ;;  %vm446_vm8 = vcmask 15360   ;;  %v551_v39 = vsub.s32 1, %v1053_v1  ;;  %s838_s25 = sshll.u32 %s908_s19, 4  ;;  %s839_s25 = int_to_ptr.vmem [resolvable:$false] %s838_s25 }
  0x43   : > { %289 = vadd.xlane.f32.xlu0 %v288_v11  ;;  %733 = vmatpush3.msk.msra.mxu1 %vm450_vm7, %v445_v28  ;;  %p836_p13 = pnand %p835_p6, %p1213_p12  ;;  %s840_s29 = scalar_lea.vmem %s839_s25, 2048 }
  0x44   : > { %p841_p10 = scmp.lt.s32.totalorder %s1151_s14, %s839_s25  ;;  %p842_p0 = scmp.lt.s32.totalorder %s840_s29, %s834_s23 }
  0x45   : > { %p837_p8 = pneg %p836_p13 }
  0x46   : > { %270 = vadd.xlane.f32.xlu1 %v261_v13  ;;  %p843_p2 = por %p842_p0, %p841_p10 }
  0x47   : > { %276 = vadd.xlane.f32.xlu0 %v264_v14 }
  0x48   : > { %p844_p4 = pnand %p843_p2, %p837_p8 }
  0x4a   : > { %278 = vadd.xlane.f32.xlu1 %v265_v17 }
  0x4b   : > { %272 = vadd.xlane.f32.xlu0 %v262_v18 }
  0x4e   : > { %280 = vadd.xlane.f32.xlu1 %v266_v21 }
  0x4f   : > { %274 = vadd.xlane.f32.xlu0 %v263_v22 }
  0x52   : > { %282 = vadd.xlane.f32.xlu1 %v267_v24 }
  0xcc   : > { %v287_v33 = vpop.xlane.xlu0 %286 }
  0xcd   : > { %v291_v34 = vmax.f32 %v287_v33, 1.0 }
  0xcf   : > { %v296_v35 = vrot.slane %v291_v34, %v1056_v2  ;;  %v269_v36 = vpop.xlane.xlu1 %268 }
  0xd0   : > { %v290_v37 = vpop.xlane.xlu0 %289 }
  0xd1   : > { %796 = vrcp.f32 %v296_v35  ;;  %v292_v38 = vmax.f32 %v290_v37, 1.0 }
  0xd3   : > { %v300_v40 = vrot.slane %v292_v38, %v1056_v2  ;;  %v271_v41 = vpop.xlane.xlu1 %270 }
  0xd4   : > { %v277_v42 = vpop.xlane.xlu0 %276 }
  0xd5   : > { %798 = vrcp.f32 %v300_v40 }
  0xd7   : > { %v279_v44 = vpop.xlane.xlu1 %278 }
  0xd8   : > { %v273_v46 = vpop.xlane.xlu0 %272 }
  0xdb   : > { %v797_v50 = vpop.eup %796  ;;  %v281_v52 = vpop.xlane.xlu1 %280 }
  0xdc   : > { %v302_v53 = vmul.f32 %v797_v50, %v269_v36  ;;  %v303_v54 = vmul.f32 %v797_v50, %v271_v41  ;;  %v304_v55 = vmul.f32 %v797_v50, %v273_v46  ;;  %v275_v56 = vpop.xlane.xlu0 %274 }
  0xdd   : > { %v305_v60 = vmul.f32 %v797_v50, %v275_v56 }
  0xde   : > { %v328_v57 = vrot.slane %v302_v53, %v327_v47  ;;  %v333_v58 = vrot.slane %v303_v54, %v332_v48  ;;  %v340_v62 = vrot.slane %v304_v55, %v339_v51 }
  0xdf   : > { %v799_v61 = vpop.eup %798  ;;  %v283_v63 = vpop.xlane.xlu1 %282  ;;  %v347_v17 = vrot.slane %v305_v60, %v346_v59 }
  0xe0   : > { %v335_v0 = vsel %vm334_vm2, %v333_v58, %v328_v57  ;;  %v307_v3 = vmul.f32 %v799_v61, %v277_v42  ;;  %v308_v5 = vmul.f32 %v799_v61, %v279_v44  ;;  %v309_v6 = vmul.f32 %v799_v61, %v281_v52 }
  0xe1   : > { %v310_v10 = vmul.f32 %v799_v61, %v283_v63  ;;  %v342_v18 = vsel %vm341_vm3, %v340_v62, %v335_v0 }
  0xe2   : > { %v353_v11 = vrot.slane %v307_v3, %v327_v47  ;;  %v357_v13 = vrot.slane %v308_v5, %v332_v48  ;;  %v362_v14 = vrot.slane %v309_v6, %v339_v51  ;;  %v349_v25 = vsel %vm348_vm4, %v347_v17, %v342_v18 }
  0xe3   : > { %v367_v22 = vrot.slane %v310_v10, %v346_v59 }
  0xe4   : > { %v358_v21 = vsel %vm334_vm2, %v357_v13, %v353_v11 }
  0xe5   : > { %v363_v24 = vsel %vm341_vm3, %v362_v14, %v358_v21 }
  0xe6   : > { %v368_v26 = vsel %vm348_vm4, %v367_v22, %v363_v24 }
  0xe7   : > { %v370_v27 = vsel %vm369_vm5, %v368_v26, %v349_v25 }
  0xe8   : > { %730 = vmatmul.mubr.msk.f32.vlgmr.msra.gmra.mrb[0].mxu0 %vm371_vm6, %v370_v27 }
 0x1bb   : > { %v440_v29 = vpop.f32.mrb[0].mxu0 }
 0x1bc   : > { %v444_v30 = vmax.f32 %v440_v29, 0.0  ;;  %v731_v31 = vpop.f32.mrb[1].mxu0 }
 0x1be   : > { %735 = vmatmul.mubr.msk.f32.vlgmr.msra.gmra.mrb[0].mxu1 %vm446_vm8, %v444_v30 }
 0x291   : > { %v520_v32 = vpop.f32.mrb[0].mxu1 }
 0x292   : > { %v703_v33 = vmul.f32 -1.442695, %v520_v32  ;;  %v736_v34 = vpop.f32.mrb[1].mxu1 }
 0x294   : > { %800 = vpow2.f32 %v703_v33 }
 0x29e   : > { %v801_v35 = vpop.eup %800 }
 0x29f   : > { %v527_v36 = vadd.f32 1.0, %v801_v35 }
 0x2a1   : > { %802 = vrcp.f32 %v527_v36 }
 0x2ab   : > { %v803_v37 = vpop.eup %802 }
 0x2ac   : > { %v533_v38 = vrot.slane %v803_v37, %v1056_v2  ;;  %v552_v40 = vrot.slane %v803_v37, %v551_v39 }
 0x2ae   : > { %539 = vbcast.lane.b32.xlu1 %v533_v38, 264  ;;  %535 = vbcast.lane.b32.xlu0 %v533_v38, 256 }
 0x2b2   : > { %543 = vbcast.lane.b32.xlu1 %v533_v38, 272  ;;  %554 = vbcast.lane.b32.xlu0 %v552_v40, 256 }
 0x2b6   : > { %547 = vbcast.lane.b32.xlu1 %v533_v38, 280  ;;  %562 = vbcast.lane.b32.xlu0 %v552_v40, 272 }
 0x2ba   : > { %558 = vbcast.lane.b32.xlu1 %v552_v40, 264 }
 0x2be   : > { %566 = vbcast.lane.b32.xlu1 %v552_v40, 280 }
 0x320   : > { %v540_v41 = vpop.permute.xlu1 %539  ;;  %v536_v42 = vpop.permute.xlu0 %535 }
 0x321   : > { %v569_v43 = vmul.f32 %v540_v41, %v1071_v9  ;;  %v568_v44 = vmul.f32 %v536_v42, %v1062_v4 }
 0x323   : > { %v577_v2 = vmul.f32 %v569_v43, %v1065_v7  ;;  %v576_v1 = vmul.f32 %v568_v44, %v1065_v7 }
 0x324   : > { %v544_v45 = vpop.permute.xlu1 %543  ;;  %v555_v46 = vpop.permute.xlu0 %554 }
 0x325   : > { %585 = vst [vmem:[%s230_s22 + $0x8] sm:$0xff] %v577_v2  ;;  %584 = vst [vmem:[%s230_s22] sm:$0xff] %v576_v1  ;;  %v570_v47 = vmul.f32 %v544_v45, %v1086_v16  ;;  %v572_v48 = vmul.f32 %v555_v46, %v1076_v12 }
 0x327   : > { %v578_v49 = vmul.f32 %v570_v47, %v1065_v7  ;;  %v580_v9 = vmul.f32 %v572_v48, %v1068_v8 }
 0x328   : > { %v548_v4 = vpop.permute.xlu1 %547  ;;  %v563_v50 = vpop.permute.xlu0 %562 }
 0x329   : > { %586 = vst [vmem:[%s230_s22 + $0x10] sm:$0xff] %v578_v49  ;;  %588 = vst [vmem:[%s230_s22 + $0x20] sm:$0xff] %v580_v9  ;;  %v571_v51 = vmul.f32 %v548_v4, %v1096_v20  ;;  %v574_v52 = vmul.f32 %v563_v50, %v1093_v19 }
 0x32b   : > { %v579_v53 = vmul.f32 %v571_v51, %v1065_v7  ;;  %v582_v16 = vmul.f32 %v574_v52, %v1068_v8 }
 0x32c   : > { %v559_v54 = vpop.permute.xlu1 %558 }
 0x32d   : > { %587 = vst [vmem:[%s230_s22 + $0x18] sm:$0xff] %v579_v53  ;;  %590 = vst [vmem:[%s230_s22 + $0x30] sm:$0xff] %v582_v16  ;;  %v573_v12 = vmul.f32 %v559_v54, %v1083_v15 }
 0x32f   : > { %v581_v55 = vmul.f32 %v573_v12, %v1068_v8 }
 0x330   : > { %v567_v56 = vpop.permute.xlu1 %566 }
 0x331   : > { %589 = vst [vmem:[%s230_s22 + $0x28] sm:$0xff] %v581_v55  ;;  %v575_v7 = vmul.f32 %v567_v56, %v1103_v23 }
 0x333   : > { %v583_v15 = vmul.f32 %v575_v7, %v1068_v8 }
 0x335   : > { %591 = vst [vmem:[%s230_s22 + $0x38] sm:$0xff] %v583_v15 }
 0x336   : > { %847 = shalt.err (!%p844_p4)
}
 0x337   : > { %s848_s30 = scalar_lea.hbm %s1157_s12, 1024  ;;  %s852_s7 = scalar_lea.hbm %s1206_s4, 2048 }
 0x338   : > { %p849_p5 = scmp.ne.s32.totalorder %s1157_s12, %s848_s30  ;;  %p853_p1 = scmp.lt.u32.totalorder %s1157_s12, %s1206_s4 }
 0x339   : > { %p854_p3 = scmp.lt.u32.totalorder %s852_s7, %s848_s30  ;;  %p856_p6 = scmp.lt.u32.totalorder %s848_s30, %s1157_s12 }
 0x33a   : > { %p850_p7 = pnand %p849_p5, %p1213_p12 }
 0x33b   : > { %p855_p11 = por %p854_p3, %p853_p1 }
 0x33c   : > { %p851_p9 = pneg %p850_p7 }
 0x33d   : > { %p857_p13 = por %p856_p6, %p855_p11 }
 0x33f   : > { %p858_p8 = pnand %p857_p13, %p851_p9 }
 0x341   : > { %861 = shalt.err (!%p858_p8)
}
 0x342   : > { %s909_s22 = smov 128   ;;  %s910_s8 = smov 8  }
 0x343   : > { %745 = dma.vmem_to_hbm [thread:$0]  (%p1213_p12), %s1151_s14, 1024, %s1157_s12, %s593_s26, %s909_s22, %s909_s22, %s910_s8  }
 0x344 PF: > { %s622_s10 = sand.u32 1, %s888_s15   ;;  %p1214_p10 = scmp.ne.s32.totalorder %s1211_s28, 0 }
 0x345   : > { %p1215_p0 = scmp.ge.s32.totalorder %s900_s18, 2  ;;  %s623_s11 = scalar_lea.sflag [#allocation4], %s622_s10 }
 0x347   : > { %p752_p2 = pnand %p1215_p0, %p1214_p10 }
 0x349   : > { %883 = dma.done.wait (!%p752_p2), %s623_s11, 1024  }
 0x34a   : > { %885 = vsyncadd (!%p752_p2), %s623_s11, 4294966272  ;;  %p17_p4 = scmp.ge.s32.totalorder %s961_s21, 4   ;;  %s1216_s15 = smov %s892_s16 }
 0x34b   : > { %s1217_s16 = smov %s896_s17  ;;  %s1218_s17 = smov %s973_s24 }
 0x34c   : > { %s1219_s18 = smov %s961_s21  ;;  %19 = sbr.rel (!%p17_p4) target bundleno = 5 (0x5), region = 84 }
 0x353   :  { %628 = vsyncpa [#allocation3], 1 }
 0x354   :  { %630 = vsyncpa [#allocation3 + $0x1], 1 }
 0x355   :  { %631 = vsyncpa [#allocation4], 1 }
 0x356   :  { %633 = vsyncpa [#allocation4 + $0x1], 1 }

</bundles_post_ra>
